<compile_context>
chip_gen: v5e
topology: v5e:2x2
jax: 0.10.0
libtpu: 0.0.40
codegen_flags: <defaults>
</compile_context>

<pallas_src>
import jax
import jax.numpy as jnp
from jax.experimental import pallas as pl
from jax.experimental.pallas import tpu as pltpu

AUX_W = 8  # packed aux slab layout: [pos(0:3) | ts(3) | node_keep(4) | pad(5:8)]


def _round_up(x: int, m: int) -> int:
    return (x + m - 1) // m * m


def omdiff_kernel(
    feat_ref,       # (T, F)      noisy node features
    aux_ref,        # (T, 8)      [pos | ts | node_keep | pad]
    w1f_ref,        # (F, H)      layer-1 weights, feature rows
    w1a_ref,        # (8, H)      layer-1 weights, aux rows (keep/pad rows = 0)
    b1_ref,         # (1, H)
    ws_ref,         # (H, F)      states head (masked feature columns zeroed)
    bs_ref,         # (1, F)      states bias  (masked feature columns zeroed)
    wp_ref,         # (H, 3)      positions head
    bp_ref,         # (1, 3)
    feat_out_ref,   # (T, F)      predicted (clean) node features
    noise_out_ref,  # (T, 3)      predicted positional noise
):
    feat = feat_ref[...]
    aux = aux_ref[...]

    # Layer 1 as a split-K matmul over [feat | aux]: avoids ever materializing
    # the concatenated MLP input in HBM or doing a lane-concat in the kernel.
    h = jnp.dot(feat, w1f_ref[...], preferred_element_type=jnp.float32)
    h = h + jnp.dot(aux, w1a_ref[...], preferred_element_type=jnp.float32)
    h = h + b1_ref[...]
    h = jnp.maximum(h, 0.0)  # ReLU

    # Two heads (MXU has huge slack at these widths).
    ys = jnp.dot(h, ws_ref[...], preferred_element_type=jnp.float32) + bs_ref[...]
    yp = jnp.dot(h, wp_ref[...], preferred_element_type=jnp.float32) + bp_ref[...]

    pos = aux[:, 0:3].astype(jnp.float32)   # initial positions
    keep = aux[:, 4:5] > 0.5                # True where node is NOT masked

    # OMDiff epilogue: noise = pred_pos - pos0; zero masked nodes (NaN-safe
    # select, matching torch.where semantics). Channel masking is already
    # folded into ws/bs.
    feat_out_ref[...] = jnp.where(keep, ys, 0.0).astype(feat_out_ref.dtype)
    noise_out_ref[...] = jnp.where(keep, yp - pos, 0.0).astype(noise_out_ref.dtype)


def omdiff_forward(
    node_features,       # (N, F) f32
    node_positions,      # (N, 3) f32
    node_mask,           # (N, 1) bool  (True = fixed / metal-center node)
    node_features_mask,  # (1, F) bool  (True = masked element channel)
    ts,                  # (num_data, 1) int
    num_nodes,           # (num_data,) int  — nodes per graph
    params,              # dict of MLP params
    timesteps=1000,
    tile_n=4096,
    transport_dtype=jnp.float32,  # set jnp.bfloat16 to halve HBM traffic (looser numerics)
    out_dtype=jnp.float32,
):
    N, F = node_features.shape
    H = params["w1"].shape[1]

    # ---- plain-JAX glue (OMDiff.forward preamble) ----
    ts_f = ts.astype(jnp.float32) / float(timesteps)
    ts_per_node = jnp.repeat(ts_f, num_nodes, axis=0, total_repeat_length=N)   # (N, 1)
    node_keep = 1.0 - node_mask.astype(jnp.float32)                            # (N, 1)

    # ---- pack the narrow per-node tensors into one (N, 8) aux slab ----
    aux = jnp.concatenate(
        [node_positions.astype(jnp.float32), ts_per_node, node_keep,
         jnp.zeros((N, AUX_W - 5), jnp.float32)],
        axis=-1).astype(transport_dtype)                                        # (N, 8)
    feat = node_features.astype(transport_dtype)                                # (N, F)

    # ---- constants (all VMEM-resident via constant index_map) ----
    w1 = params["w1"].astype(jnp.float32)                       # (F+4, H) = [feat|pos|ts]
    w1f = w1[:F].astype(transport_dtype)                        # (F, H)
    w1a = jnp.zeros((AUX_W, H), jnp.float32).at[:4].set(w1[F:F + 4]).astype(transport_dtype)
    b1 = params["b1"].astype(jnp.float32)                       # (1, H)
    feat_keep = 1.0 - node_features_mask.astype(jnp.float32)    # (1, F) 0/1
    ws = (params["ws"].astype(jnp.float32) * feat_keep).astype(transport_dtype)  # (H, F)
    bs = params["bs"].astype(jnp.float32) * feat_keep                            # (1, F)
    wp = params["wp"].astype(transport_dtype)                                    # (H, 3)
    bp = params["bp"].astype(jnp.float32)                                        # (1, 3)

    # ---- node-axis tiling (no wrapper-side padding: Pallas masks the ragged tile) ----
    N8 = _round_up(max(N, 1), 8)
    TILE_N = max(8, (int(tile_n) // 8) * 8)     # multiple of 8 (sublane constraint)
    TILE_N = min(TILE_N, 8192, N8)
    if N8 >= 16:
        # keep >= 2 node tiles so v7x's two TensorCores both get work
        TILE_N = min(TILE_N, _round_up((N8 + 1) // 2, 8))
    grid = (pl.cdiv(N, TILE_N),)

    # ---- explicit VMEM budget (double-buffered, lane dims pad to 128 in VMEM) ----
    in_isz = jnp.dtype(transport_dtype).itemsize
    out_isz = jnp.dtype(out_dtype).itemsize
    buf_bytes = 2 * TILE_N * 128 * (2 * in_isz + 2 * out_isz)   # feat+aux in, 2 outs
    vmem_limit = max(16 << 20, min(int(buf_bytes * 1.5) + (4 << 20), 64 << 20))

    # ---- advisory cost estimate (memory-bound custom call) ----
    flops = 2 * N * H * (F + AUX_W) + 2 * N * H * (F + 3)
    bytes_accessed = (N * (F + AUX_W)) * in_isz + N * (F + 3) * out_isz \
        + ((F + AUX_W) * H + H * (F + 3)) * in_isz + (H + F + 3) * 4
    cost = pl.CostEstimate(flops=int(flops), transcendentals=0,
                           bytes_accessed=int(bytes_accessed))

    row = lambda c: pl.BlockSpec((TILE_N, c), lambda i: (i, 0))   # tiled over nodes
    cst = lambda s: pl.BlockSpec(s, lambda i: (0, 0))             # VMEM-resident constants

    feats_out, noise_out = pl.pallas_call(
        omdiff_kernel,
        out_shape=(jax.ShapeDtypeStruct((N, F), out_dtype),
                   jax.ShapeDtypeStruct((N, 3), out_dtype)),
        grid_spec=pltpu.PrefetchScalarGridSpec(
            num_scalar_prefetch=0,
            grid=grid,
            in_specs=[
                row(F), row(AUX_W),
                cst((F, H)), cst((AUX_W, H)), cst((1, H)),
                cst((H, F)), cst((1, F)), cst((H, 3)), cst((1, 3)),
            ],
            out_specs=(
                pl.BlockSpec((TILE_N, F), lambda i: (i, 0)),
                pl.BlockSpec((TILE_N, 3), lambda i: (i, 0)),
            ),
        ),
        compiler_params=pltpu.CompilerParams(
            dimension_semantics=("parallel",),   # node tiles are independent
            vmem_limit_bytes=int(vmem_limit),
        ),
        cost_estimate=cost,
    )(feat, aux, w1f, w1a, b1, ws, bs, wp, bp)

    return {"node_features": feats_out, "node_positions": noise_out}


def reference_forward(node_features, node_positions, node_mask,
                      node_features_mask, ts, num_nodes, params, timesteps=1000):
    """Pure-JAX reference of the same semantics (for a correctness check)."""
    N, F = node_features.shape
    ts_f = ts.astype(jnp.float32) / float(timesteps)
    ts_per_node = jnp.repeat(ts_f, num_nodes, axis=0, total_repeat_length=N)
    x = jnp.concatenate([node_features, node_positions, ts_per_node], axis=-1)
    h = jnp.maximum(x @ params["w1"] + params["b1"], 0.0)
    node_states = h @ params["ws"] + params["bs"]
    pred_pos = h @ params["wp"] + params["bp"]
    features_mask = jnp.logical_or(node_mask, node_features_mask)
    feats = jnp.where(features_mask, 0.0, node_states)
    noise = pred_pos - node_positions
    noise = jnp.where(node_mask, 0.0, noise)
    return feats, noise


if __name__ == "__main__":
    key = jax.random.PRNGKey(0)

    # ------- problem sizes (small, consistent with the module) -------
    num_data = 2
    num_nodes = jnp.array([5, 11], dtype=jnp.int32)   # nodes per graph
    N = 16                                            # total nodes
    node_labels = [1, 6, 7, 8, 16, 26, 29, 30]        # element vocabulary
    masked_node_labels = [26, 29, 30]                 # metal centers (masked)
    F = len(node_labels)                              # one-hot feature dim = 8
    H = 32                                            # hidden width
    timesteps = 1000

    # ------- node_features_mask buffer (as in OMDiff.__init__) -------
    sorted_labels = sorted(node_labels)
    mask_row = [1 if lbl in set(masked_node_labels) else 0 for lbl in sorted_labels]
    node_features_mask = jnp.array([mask_row], dtype=bool)            # (1, F)

    # ------- deterministic inputs -------
    k1, k2, k3, k4, k5, k6, k7, k8, k9 = jax.random.split(key, 9)
    node_features = jax.random.normal(k1, (N, F), dtype=jnp.float32)
    node_positions = jax.random.normal(k2, (N, 3), dtype=jnp.float32)
    node_mask = jax.random.bernoulli(k3, 0.25, (N, 1))                # (N, 1) bool
    ts = jax.random.randint(k4, (num_data, 1), 0, timesteps + 1)      # (num_data, 1)

    # ------- deterministic denoising-net parameters -------
    params = {
        "w1": jax.random.normal(k5, (F + 3 + 1, H), dtype=jnp.float32) * 0.1,
        "b1": jax.random.normal(k6, (1, H), dtype=jnp.float32) * 0.01,
        "ws": jax.random.normal(k7, (H, F), dtype=jnp.float32) * 0.1,
        "bs": jnp.zeros((1, F), dtype=jnp.float32),
        "wp": jax.random.normal(k8, (H, 3), dtype=jnp.float32) * 0.1,
        "bp": jax.random.normal(k9, (1, 3), dtype=jnp.float32) * 0.01,
    }

    out = omdiff_forward(
        node_features, node_positions, node_mask, node_features_mask,
        ts, num_nodes, params, timesteps=timesteps,
    )
    jax.block_until_ready(out)

    ref_feats, ref_noise = reference_forward(
        node_features, node_positions, node_mask, node_features_mask,
        ts, num_nodes, params, timesteps=timesteps,
    )
    assert out["node_features"].shape == (N, F)
    assert out["node_positions"].shape == (N, 3)
    assert jnp.allclose(out["node_features"], ref_feats, atol=1e-5, rtol=1e-4)
    assert jnp.allclose(out["node_positions"], ref_noise, atol=1e-5, rtol=1e-4)

    print("KERNEL_OK")
</pallas_src>

<mosaic_0001>
module attributes {stable_mosaic.version = 11 : i64} {
  func.func @omdiff_kernel(%arg0: i32, %arg1: memref<8x8xf32, #tpu.memory_space<vmem>>, %arg2: memref<8x8xf32, #tpu.memory_space<vmem>>, %arg3: memref<8x32xf32, #tpu.memory_space<vmem>>, %arg4: memref<8x32xf32, #tpu.memory_space<vmem>>, %arg5: memref<1x32xf32, #tpu.memory_space<vmem>>, %arg6: memref<32x8xf32, #tpu.memory_space<vmem>>, %arg7: memref<1x8xf32, #tpu.memory_space<vmem>>, %arg8: memref<32x3xf32, #tpu.memory_space<vmem>>, %arg9: memref<1x3xf32, #tpu.memory_space<vmem>>, %arg10: memref<8x8xf32, #tpu.memory_space<vmem>>, %arg11: memref<8x3xf32, #tpu.memory_space<vmem>>) attributes {dimension_semantics = [#tpu.dimension_semantics<parallel>], iteration_bounds = array<i64: 2>, scalar_prefetch = 0 : i64, scratch_operands = 0 : i64, tpu.core_type = #tpu.core_type<tc>, window_params = [{transform_indices = @transform_0, window_bounds = array<i64: 8, 8>}, {transform_indices = @transform_1, window_bounds = array<i64: 8, 8>}, {pipeline_mode = #tpu.pipeline_mode<synchronous>, transform_indices = @transform_2, window_bounds = array<i64: 8, 32>}, {pipeline_mode = #tpu.pipeline_mode<synchronous>, transform_indices = @transform_3, window_bounds = array<i64: 8, 32>}, {pipeline_mode = #tpu.pipeline_mode<synchronous>, transform_indices = @transform_4, window_bounds = array<i64: 1, 32>}, {pipeline_mode = #tpu.pipeline_mode<synchronous>, transform_indices = @transform_5, window_bounds = array<i64: 32, 8>}, {pipeline_mode = #tpu.pipeline_mode<synchronous>, transform_indices = @transform_6, window_bounds = array<i64: 1, 8>}, {pipeline_mode = #tpu.pipeline_mode<synchronous>, transform_indices = @transform_7, window_bounds = array<i64: 32, 3>}, {pipeline_mode = #tpu.pipeline_mode<synchronous>, transform_indices = @transform_8, window_bounds = array<i64: 1, 3>}, {transform_indices = @transform_9, window_bounds = array<i64: 8, 8>}, {transform_indices = @transform_10, window_bounds = array<i64: 8, 3>}]} {
    %c0 = arith.constant 0 : index
    %c0_0 = arith.constant 0 : index
    %0 = vector.load %arg1[%c0, %c0_0] : memref<8x8xf32, #tpu.memory_space<vmem>>, vector<8x8xf32>
    %c0_1 = arith.constant 0 : index
    %c0_2 = arith.constant 0 : index
    %1 = vector.load %arg2[%c0_1, %c0_2] : memref<8x8xf32, #tpu.memory_space<vmem>>, vector<8x8xf32>
    %c0_3 = arith.constant 0 : index
    %c0_4 = arith.constant 0 : index
    %2 = vector.load %arg3[%c0_3, %c0_4] : memref<8x32xf32, #tpu.memory_space<vmem>>, vector<8x32xf32>
    %cst = arith.constant dense<0.000000e+00> : vector<8x32xf32>
    %3 = tpu.matmul %0, %2, %cst {dimension_numbers = #tpu.dot_dimension_numbers<[1], [0], [0], [1], [0, 0, 1, 1], [], []>} : vector<8x8xf32>, vector<8x32xf32>, vector<8x32xf32> -> vector<8x32xf32>
    %c0_5 = arith.constant 0 : index
    %c0_6 = arith.constant 0 : index
    %4 = vector.load %arg4[%c0_5, %c0_6] : memref<8x32xf32, #tpu.memory_space<vmem>>, vector<8x32xf32>
    %cst_7 = arith.constant dense<0.000000e+00> : vector<8x32xf32>
    %5 = tpu.matmul %1, %4, %cst_7 {dimension_numbers = #tpu.dot_dimension_numbers<[1], [0], [0], [1], [0, 0, 1, 1], [], []>} : vector<8x8xf32>, vector<8x32xf32>, vector<8x32xf32> -> vector<8x32xf32>
    %6 = arith.addf %3, %5 : vector<8x32xf32>
    %c0_8 = arith.constant 0 : index
    %c0_9 = arith.constant 0 : index
    %7 = vector.load %arg5[%c0_8, %c0_9] : memref<1x32xf32, #tpu.memory_space<vmem>>, vector<1x32xf32>
    %8 = vector.broadcast %7 : vector<1x32xf32> to vector<8x32xf32>
    %9 = arith.addf %6, %8 : vector<8x32xf32>
    %cst_10 = arith.constant 0.000000e+00 : f32
    %10 = vector.broadcast %cst_10 : f32 to vector<8x32xf32>
    %11 = arith.maximumf %9, %10 : vector<8x32xf32>
    %c0_11 = arith.constant 0 : index
    %c0_12 = arith.constant 0 : index
    %12 = vector.load %arg6[%c0_11, %c0_12] : memref<32x8xf32, #tpu.memory_space<vmem>>, vector<32x8xf32>
    %cst_13 = arith.constant dense<0.000000e+00> : vector<8x8xf32>
    %13 = tpu.matmul %11, %12, %cst_13 {dimension_numbers = #tpu.dot_dimension_numbers<[1], [0], [0], [1], [0, 0, 1, 1], [], []>} : vector<8x32xf32>, vector<32x8xf32>, vector<8x8xf32> -> vector<8x8xf32>
    %c0_14 = arith.constant 0 : index
    %c0_15 = arith.constant 0 : index
    %14 = vector.load %arg7[%c0_14, %c0_15] : memref<1x8xf32, #tpu.memory_space<vmem>>, vector<1x8xf32>
    %15 = vector.broadcast %14 : vector<1x8xf32> to vector<8x8xf32>
    %16 = arith.addf %13, %15 : vector<8x8xf32>
    %c0_16 = arith.constant 0 : index
    %c0_17 = arith.constant 0 : index
    %17 = vector.load %arg8[%c0_16, %c0_17] : memref<32x3xf32, #tpu.memory_space<vmem>>, vector<32x3xf32>
    %cst_18 = arith.constant dense<0.000000e+00> : vector<8x3xf32>
    %18 = tpu.matmul %11, %17, %cst_18 {dimension_numbers = #tpu.dot_dimension_numbers<[1], [0], [0], [1], [0, 0, 1, 1], [], []>} : vector<8x32xf32>, vector<32x3xf32>, vector<8x3xf32> -> vector<8x3xf32>
    %c0_19 = arith.constant 0 : index
    %c0_20 = arith.constant 0 : index
    %19 = vector.load %arg9[%c0_19, %c0_20] : memref<1x3xf32, #tpu.memory_space<vmem>>, vector<1x3xf32>
    %20 = vector.broadcast %19 : vector<1x3xf32> to vector<8x3xf32>
    %21 = arith.addf %18, %20 : vector<8x3xf32>
    %22 = vector.extract_strided_slice %1 {offsets = [0, 0], sizes = [8, 3], strides = [1, 1]} : vector<8x8xf32> to vector<8x3xf32>
    %23 = vector.extract_strided_slice %1 {offsets = [0, 4], sizes = [8, 1], strides = [1, 1]} : vector<8x8xf32> to vector<8x1xf32>
    %cst_21 = arith.constant 5.000000e-01 : f32
    %24 = vector.broadcast %cst_21 : f32 to vector<8x1xf32>
    %25 = arith.cmpf ogt, %23, %24 : vector<8x1xf32>
    %cst_22 = arith.constant 0.000000e+00 : f32
    %26 = vector.shape_cast %25 : vector<8x1xi1> to vector<8x1xi1>
    %27 = vector.broadcast %26 : vector<8x1xi1> to vector<8x8xi1>
    %28 = vector.broadcast %cst_22 : f32 to vector<8x8xf32>
    %29 = arith.select %27, %16, %28 : vector<8x8xi1>, vector<8x8xf32>
    %c0_23 = arith.constant 0 : index
    %c0_24 = arith.constant 0 : index
    %30 = vector.load %arg10[%c0_23, %c0_24] : memref<8x8xf32, #tpu.memory_space<vmem>>, vector<8x8xf32>
    tpu.vector_store %arg10[%c0_23, %c0_24], %29 {strides = array<i32>} : memref<8x8xf32, #tpu.memory_space<vmem>>, vector<8x8xf32>,
    %31 = arith.subf %21, %22 : vector<8x3xf32>
    %cst_25 = arith.constant 0.000000e+00 : f32
    %32 = vector.shape_cast %25 : vector<8x1xi1> to vector<8x1xi1>
    %33 = vector.broadcast %32 : vector<8x1xi1> to vector<8x3xi1>
    %34 = vector.broadcast %cst_25 : f32 to vector<8x3xf32>
    %35 = arith.select %33, %31, %34 : vector<8x3xi1>, vector<8x3xf32>
    %c0_26 = arith.constant 0 : index
    %c0_27 = arith.constant 0 : index
    %36 = vector.load %arg11[%c0_26, %c0_27] : memref<8x3xf32, #tpu.memory_space<vmem>>, vector<8x3xf32>
    tpu.vector_store %arg11[%c0_26, %c0_27], %35 {strides = array<i32>} : memref<8x3xf32, #tpu.memory_space<vmem>>, vector<8x3xf32>,
    return
  }
  func.func @transform_0(%arg0: i32) -> (i32, i32) {
    %c0_i32 = arith.constant 0 : i32
    %c0_i32_0 = arith.constant 0 : i32
    return %arg0, %c0_i32 : i32, i32
  }
  func.func @transform_1(%arg0: i32) -> (i32, i32) {
    %c0_i32 = arith.constant 0 : i32
    %c0_i32_0 = arith.constant 0 : i32
    return %arg0, %c0_i32 : i32, i32
  }
  func.func @transform_2(%arg0: i32) -> (i32, i32) {
    %c0_i32 = arith.constant 0 : i32
    %c0_i32_0 = arith.constant 0 : i32
    %c0_i32_1 = arith.constant 0 : i32
    return %c0_i32, %c0_i32_0 : i32, i32
  }
  func.func @transform_3(%arg0: i32) -> (i32, i32) {
    %c0_i32 = arith.constant 0 : i32
    %c0_i32_0 = arith.constant 0 : i32
    %c0_i32_1 = arith.constant 0 : i32
    return %c0_i32, %c0_i32_0 : i32, i32
  }
  func.func @transform_4(%arg0: i32) -> (i32, i32) {
    %c0_i32 = arith.constant 0 : i32
    %c0_i32_0 = arith.constant 0 : i32
    %c0_i32_1 = arith.constant 0 : i32
    return %c0_i32, %c0_i32_0 : i32, i32
  }
  func.func @transform_5(%arg0: i32) -> (i32, i32) {
    %c0_i32 = arith.constant 0 : i32
    %c0_i32_0 = arith.constant 0 : i32
    %c0_i32_1 = arith.constant 0 : i32
    return %c0_i32, %c0_i32_0 : i32, i32
  }
  func.func @transform_6(%arg0: i32) -> (i32, i32) {
    %c0_i32 = arith.constant 0 : i32
    %c0_i32_0 = arith.constant 0 : i32
    %c0_i32_1 = arith.constant 0 : i32
    return %c0_i32, %c0_i32_0 : i32, i32
  }
  func.func @transform_7(%arg0: i32) -> (i32, i32) {
    %c0_i32 = arith.constant 0 : i32
    %c0_i32_0 = arith.constant 0 : i32
    %c0_i32_1 = arith.constant 0 : i32
    return %c0_i32, %c0_i32_0 : i32, i32
  }
  func.func @transform_8(%arg0: i32) -> (i32, i32) {
    %c0_i32 = arith.constant 0 : i32
    %c0_i32_0 = arith.constant 0 : i32
    %c0_i32_1 = arith.constant 0 : i32
    return %c0_i32, %c0_i32_0 : i32, i32
  }
  func.func @transform_9(%arg0: i32) -> (i32, i32) {
    %c0_i32 = arith.constant 0 : i32
    %c0_i32_0 = arith.constant 0 : i32
    return %arg0, %c0_i32 : i32, i32
  }
  func.func @transform_10(%arg0: i32) -> (i32, i32) {
    %c0_i32 = arith.constant 0 : i32
    %c0_i32_0 = arith.constant 0 : i32
    return %arg0, %c0_i32 : i32, i32
  }
}

</mosaic_0001>

<bundles_post_ra>
// kernel: tpu_custom_call.1
= control target key start
LH: loop header
LB: loop body
LE: loop exit
PB: predicated region body
PF: predicated region fallthrough
CT: control target
= control target key end

     0   :  { %s702_s13 = smov 0   ;;  %s773_s0 = inlined_call_operand.vmem [shape: f32[16,8], index: 0, kind: input, shape index: {}]   ;;  %s774_s1 = inlined_call_operand.vmem [shape: f32[16,8], index: 1, kind: input, shape index: {}]   ;;  %s775_s2 = inlined_call_operand.vmem [shape: f32[8,32], index: 2, kind: input, shape index: {}]   ;;  %s776_s3 = inlined_call_operand.vmem [shape: f32[8,32], index: 3, kind: input, shape index: {}]   ;;  %s777_s4 = inlined_call_operand.vmem [shape: f32[1,32], index: 4, kind: input, shape index: {}]   ;;  %s778_s5 = inlined_call_operand.vmem [shape: f32[32,8], index: 5, kind: input, shape index: {}]   ;;  %s779_s6 = inlined_call_operand.vmem [shape: f32[1,8], index: 6, kind: input, shape index: {}]   ;;  %s780_s7 = inlined_call_operand.vmem [shape: f32[32,3], index: 7, kind: input, shape index: {}]   ;;  %s781_s8 = inlined_call_operand.vmem [shape: f32[1,3], index: 8, kind: input, shape index: {}]   ;;  %s782_s9 = inlined_call_operand.vmem [shape: f32[16,8], index: 9, kind: output, shape index: {0}]   ;;  %s783_s10 = inlined_call_operand.vmem [shape: f32[16,3], index: 10, kind: output, shape index: {1}]  }
   0x1 LB: > { %s608_s14 = sadd.s32 4294967295, %s643_s13   ;;  %p612_p0 = scmp.ge.s32.totalorder %s643_s13, 1  ;;  %s643_s13 = sphi %s702_s13, %s21_s13  }
   0x2   : > { %p323_p1 = scmp.lt.s32.totalorder %s643_s13, 3 }
   0x4   : > { %p324_p2 = pnand %p612_p0, %p323_p1 }
   0x5   : > { %p367_p3 = scmp.lt.s32.totalorder (!%p324_p2), %s608_s14, 1 }
   0x6   : > { %327 = sbr.rel (%p324_p2) target bundleno = 286 (0x11e), region = 56 }
   0xb   : > { %v386_v0 = vld [vmem:[%s776_s3] sm:$0xff]  ;;  %s785_s14 = smov (!%p367_p3, %s608_s14), 1  ;;  %vm387_vm0 = vcmask 64512   ;;  %v443_v4 = vld [vmem:[%s778_s5 + $0x18] sm:$0xff]  ;;  %v442_v6 = vld [vmem:[%s778_s5 + $0x10] sm:$0xff]  ;;  %v645_v12 = vmov 4  }
   0xc   : > { %v385_v1 = vld [vmem:[%s775_s2] sm:$0xff]  ;;  %406 = vmatpush.msra.mxu0 %v386_v0  ;;  %s716_s19 = sshll.u32 %s785_s14, 3  ;;  %v475_v5 = vld [vmem:[%s780_s7 + $0x18] sm:$0xff]  ;;  %464 = vmatpush.msra.mxu2 %v443_v4  ;;  %v474_v7 = vld [vmem:[%s780_s7 + $0x10] sm:$0xff]  ;;  %v646_v13 = vmov 0   ;;  %vm448_vm2 = vcmask 261120  }
   0xd   : > { %429 = vmatpush.msra.mxu1 %v385_v1  ;;  %s374_s22 = scalar_lea.vmem %s774_s1, %s716_s19  ;;  %s370_s25 = scalar_lea.vmem %s773_s0, %s716_s19  ;;  %492 = vmatpush.msra.mxu3 %v475_v5  ;;  %v441_v8 = vld [vmem:[%s778_s5 + $0x8] sm:$0xff]  ;;  %v440_v10 = vld [vmem:[%s778_s5] sm:$0xff]  ;;  %vm510_vm4 = vcmask 23552  }
   0xe   : > { %v384_v2 = vld [vmem:[%s374_s22] sm:$0xff]  ;;  %465 = vmatpush.msra.mxu2 %v442_v6  ;;  %v473_v9 = vld [vmem:[%s780_s7 + $0x8] sm:$0xff]  ;;  %633 = vset.pattern.permute.xlu0 %v645_v12  ;;  %s378_s12 = scalar_lea.vmem %s782_s9, %s716_s19  ;;  %s382_s16 = scalar_lea.vmem %s783_s10, %s716_s19 }
   0xf   : > { %v383_v3 = vld [vmem:[%s370_s25] sm:$0xff]  ;;  %617 = vmatmul.msk.f32.vlgmr.msra.gmra.mxu0 %vm387_vm0, %v384_v2  ;;  %493 = vmatpush.msra.mxu3 %v474_v7  ;;  %vm500_vm1 = vcmp.gt.f32.partialorder %v384_v2, 0.5 }
  0x10   : > { %618 = vmatmul.msk.f32.vlgmr.msra.gmra.mxu1 %vm387_vm0, %v383_v3  ;;  %466 = vmatpush.msra.mxu2 %v441_v8  ;;  %v472_v11 = vld [vmem:[%s780_s7] sm:$0xff]  ;;  %v501_v14 = vsel %vm500_vm1, 1, %v646_v13 }
  0x11   : > { %494 = vmatpush.msra.mxu3 %v473_v9  ;;  %503 = vperm.xlu0 %633, %v501_v14   ;;  %v634_v15 = vld [vmem:[%s777_s4] ss:$0 sm:$0xff] }
  0x12   : > { %467 = vmatpush.msra.mxu2 %v440_v10  ;;  %v635_v21 = vld [vmem:[%s779_s6] ss:$0 sm:$0xff] }
  0x13   : > { %495 = vmatpush.msra.mxu3 %v472_v11  ;;  %v636_v22 = vld [vmem:[%s781_s8] ss:$0 sm:$0xff] }
  0x83   : > { %v504_v23 = vpop.permute.xlu0 %503 }
  0x84   : > { %vm505_vm3 = vcmp.eq.s32.totalorder %v504_v23, 1 }
  0x8c   : > { %v408_v16 = vpop.f32.mrf.mxu0 }
  0x8d   : > { %v431_v17 = vpop.f32.mrf.mxu1 }
  0x8e   : > { %v432_v18 = vadd.f32 %v431_v17, %v408_v16 }
  0x90   : > { %v438_v19 = vadd.f32 %v634_v15, %v432_v18 }
  0x92   : > { %v439_v20 = vmax.f32 %v438_v19, 0.0 }
  0x94   : > { %619 = vmatmul.msk.f32.vlgmr.msra.gmra.mxu2 %vm448_vm2, %v439_v20  ;;  %620 = vmatmul.msk.f32.vlgmr.msra.gmra.mxu3 %vm448_vm2, %v439_v20 }
 0x117   : > { %v469_v24 = vpop.f32.mrf.mxu2  ;;  %v497_v25 = vpop.f32.mrf.mxu3 }
 0x118   : > { %v470_v26 = vadd.f32 %v635_v21, %v469_v24  ;;  %v498_v27 = vadd.f32 %v636_v22, %v497_v25 }
 0x11a   : > { %v508_v28 = vsub.f32 %v498_v27, %v384_v2  ;;  %v506_v29 = vsel %vm505_vm3, %v470_v26, 0.0 }
 0x11b   : > { %507 = vst.msk [vmem:[%s378_s12] sm:$0xff] %vm387_vm0, %v506_v29 }
 0x11c   : > { %v509_v30 = vsel %vm505_vm3, %v508_v28, 0.0 }
 0x11d   : > { %511 = vst.msk [vmem:[%s382_s16] sm:$0xff] %vm510_vm4, %v509_v30 }
 0x11e PF: > { %s21_s13 = sadd.s32 1, %s643_s13  }
 0x11f   : > { %p18_p4 = scmp.ge.s32.totalorder %s21_s13, 4  }
 0x121   :  { %20 = sbr.rel (!%p18_p4) target bundleno = 1 (0x1), region = 101 }

</bundles_post_ra>
